<compile_context>
chip_gen: v7x
topology: tpu7x:2x2x1
jax: 0.10.0
libtpu: 0.0.40
codegen_flags: <defaults>
</compile_context>

<pallas_src>
import functools
import math

import jax
import jax.numpy as jnp
from jax.experimental import pallas as pl
from jax.experimental.pallas import tpu as pltpu

_NEG_LOG_1E4 = -math.log(1e-4)      # log term of the clipped one-hot (constant)
_DEFAULT_TILE_N = 65536             # samples per grid step on the lane axis


def _round_up(x, m):
    return (x + m - 1) // m * m


def _default_core_splits():
    """2 on multi-TensorCore chips (v7x / megacore v3/v4/v5p), 1 on v5e/v6e."""
    try:
        kind = jax.devices()[0].device_kind.lower()
    except Exception:
        return 1
    if any(t in kind for t in ("lite", "v5e", "v6")):       # single-TC inference chips
        return 1
    if any(t in kind for t in ("v7", "tpu7", "7x", "v3", "v4", "v5p")):
        return 2
    return 1                                                 # safe default


def _sce_kernel(pred_ref, labels_ref, out_ref, *, ignore_index, n_total, tile_n):
    c = pl.program_id(0)            # core-split index ("parallel")
    i = pl.program_id(1)            # N-reduction index ("arbitrary")
    num_inner = pl.num_programs(1)

    # The (3, tile_n) output block is revisited for every i of this c: per-core
    # vector accumulator (row 0: ce*valid, row 1: valid count, row 2: rce*in_range).
    @pl.when(i == 0)
    def _init():
        out_ref[...] = jnp.zeros_like(out_ref)

    logits = pred_ref[...].astype(jnp.float32)             # (C, tile_n)
    labels = labels_ref[...]                               # (1, tile_n) int32

    # Logical sample index of every lane; columns >= n_total (ragged tail / clamped
    # duplicate blocks) contain unspecified data and are masked out via selects.
    col = (c * num_inner + i) * tile_n + jax.lax.broadcasted_iota(
        jnp.int32, (1, tile_n), 1)
    in_range = col < n_total                                # (1, tile_n) bool
    valid = jnp.logical_and(labels != ignore_index, in_range)

    class_ids = jax.lax.broadcasted_iota(jnp.int32, logits.shape, 0)
    onehot = (class_ids == labels).astype(jnp.float32)      # (C, tile_n)

    # ----- cross entropy: -log_softmax[label] without materializing log_probs ----
    m = jnp.max(logits, axis=0, keepdims=True)              # (1, tile_n)
    e = jnp.exp(logits - m)                                 # (C, tile_n), EUP
    sumexp = jnp.sum(e, axis=0, keepdims=True)              # (1, tile_n)
    logit_y = jnp.sum(onehot * logits, axis=0, keepdims=True)
    ce_per = m + jnp.log(sumexp) - logit_y                  # (1, tile_n)

    # ----- reverse cross entropy --------------------------------------------------
    # log(clip(onehot, 1e-4, 1)) is 0 on the target class and log(1e-4) elsewhere,
    # so rce = -log(1e-4) * (1 - p_y) = -log(1e-4) * (sumexp - e_y) / sumexp with
    # e_y = exp(logit_y - m); e_y is forced to 0 when no class matches the label
    # (ignore_index), matching the all-zero one-hot case. All (1, tile_n) ops.
    e_y = jnp.where(valid, jnp.exp(logit_y - m), 0.0)
    rce_per = _NEG_LOG_1E4 * (sumexp - e_y) / sumexp

    # Select (not multiply) so NaN/Inf from unspecified OOB columns can't leak in.
    ce_c = jnp.where(valid, ce_per, 0.0)
    valid_c = valid.astype(jnp.float32)
    rce_c = jnp.where(in_range, rce_per, 0.0)

    # Single merged accumulator update instead of three 1-sublane sliced RMWs.
    row = jax.lax.broadcasted_iota(jnp.int32, (3, tile_n), 0)
    out_ref[...] += jnp.where(row == 0, ce_c, jnp.where(row == 1, valid_c, rce_c))


def sce_loss(pred, labels, *, alpha=0.1, beta=1.0, num_classes=10,
             ignore_index=255, tile_n=_DEFAULT_TILE_N, core_splits=None):
    """pred: (N, C) logits (f32 or bf16); labels: (N,) int. Returns scalar loss."""
    N, C = pred.shape
    assert C == num_classes
    if core_splits is None:
        core_splits = _default_core_splits()

    # Lane-dense layout: classes -> sublanes, samples -> lanes. The transpose is the
    # only extra HBM pass over pred (no padding copy); bf16 callers DMA half the
    # bytes and the kernel upcasts after the DMA.
    pred_t = pred.T                                         # (C, N)
    labels2d = labels.astype(jnp.int32).reshape(1, N)

    tile_n = _round_up(min(tile_n, _round_up(max(N, 1), 128)), 128)
    n_blocks = pl.cdiv(N, tile_n)
    core_splits = max(1, min(core_splits, n_blocks))
    num_inner = pl.cdiv(n_blocks, core_splits)

    def block_col(c, i):
        b = c * num_inner + i
        if core_splits * num_inner == n_blocks:
            return b
        # A fully out-of-range grid step re-reads the last valid block; the kernel's
        # `in_range` mask zeroes its contribution.
        return jnp.minimum(b, n_blocks - 1)

    kernel = functools.partial(
        _sce_kernel, ignore_index=int(ignore_index), n_total=N, tile_n=tile_n)

    partials = pl.pallas_call(
        kernel,
        out_shape=jax.ShapeDtypeStruct((3, core_splits * tile_n), jnp.float32),
        grid_spec=pltpu.PrefetchScalarGridSpec(
            num_scalar_prefetch=0,
            grid=(core_splits, num_inner),
            in_specs=[
                pl.BlockSpec((C, tile_n), lambda c, i: (0, block_col(c, i))),
                pl.BlockSpec((1, tile_n), lambda c, i: (0, block_col(c, i))),
            ],
            out_specs=pl.BlockSpec((3, tile_n), lambda c, i: (0, c)),
        ),
        compiler_params=pltpu.CompilerParams(
            dimension_semantics=("parallel", "arbitrary"),
            vmem_limit_bytes=32 * 1024 * 1024),
    )(pred_t, labels2d)

    # Tiny epilogue: cross-core / cross-lane combine + alpha/beta mix.
    ce_sum = jnp.sum(partials[0])
    n_valid = jnp.sum(partials[1])   # NaN/Inf if every label is ignored (matches torch)
    rce_sum = jnp.sum(partials[2])   # rce mean is over all N samples, as in the module
    return alpha * ce_sum / n_valid + beta * rce_sum / N


def _sce_loss_ref(pred, labels, *, alpha, beta, num_classes, ignore_index):
    """Pure-JAX reference mirroring the PyTorch forward."""
    pred = pred.astype(jnp.float32)
    log_probs = jax.nn.log_softmax(pred, axis=1)
    onehot = jax.nn.one_hot(labels, num_classes, dtype=jnp.float32)
    valid = (labels != ignore_index).astype(jnp.float32)
    ce_per = -jnp.sum(onehot * log_probs, axis=1)
    ce = jnp.sum(ce_per * valid) / jnp.sum(valid)
    probs = jnp.clip(jax.nn.softmax(pred, axis=1), 1e-7, 1.0)
    rce = -jnp.sum(probs * jnp.log(jnp.clip(onehot, 1e-4, 1.0)), axis=1)
    return alpha * ce + beta * jnp.mean(rce)


if __name__ == "__main__":
    alpha, beta, num_classes = 0.1, 1.0, 10
    key = jax.random.PRNGKey(0)

    # Case 1: small batch with ignore_index labels (single ragged block).
    k1, k2 = jax.random.split(key)
    N = 64
    pred = jax.random.normal(k1, (N, num_classes), dtype=jnp.float32)
    labels = jax.random.randint(k2, (N,), 0, num_classes, dtype=jnp.int32)
    labels = labels.at[5].set(255).at[17].set(255)   # exercise ignore_index masking
    loss = sce_loss(pred, labels, alpha=alpha, beta=beta,
                    num_classes=num_classes, ignore_index=255)
    jax.block_until_ready(loss)
    ref = _sce_loss_ref(pred, labels, alpha=alpha, beta=beta,
                        num_classes=num_classes, ignore_index=255)
    assert jnp.allclose(loss, ref, rtol=2e-3, atol=2e-3), (loss, ref)

    # Case 2: N not a multiple of the tile, small forced tile + 2-way core split,
    # to exercise the ragged tail and the clamped (fully out-of-range) grid steps.
    k3, k4 = jax.random.split(k2)
    N2 = 300
    pred2 = jax.random.normal(k3, (N2, num_classes), dtype=jnp.float32)
    labels2 = jax.random.randint(k4, (N2,), 0, num_classes, dtype=jnp.int32)
    labels2 = labels2.at[0].set(255).at[299].set(255)
    loss2 = sce_loss(pred2, labels2, alpha=alpha, beta=beta,
                     num_classes=num_classes, ignore_index=255,
                     tile_n=128, core_splits=2)
    jax.block_until_ready(loss2)
    ref2 = _sce_loss_ref(pred2, labels2, alpha=alpha, beta=beta,
                         num_classes=num_classes, ignore_index=255)
    assert jnp.allclose(loss2, ref2, rtol=2e-3, atol=2e-3), (loss2, ref2)

    print("KERNEL_OK")
</pallas_src>

<mosaic_0001>
module attributes {stable_mosaic.version = 11 : i64} {
  func.func @_sce_kernel(%arg0: i32, %arg1: i32, %arg2: memref<10x128xf32, #tpu.memory_space<vmem>>, %arg3: memref<1x128xi32, #tpu.memory_space<vmem>>, %arg4: memref<3x128xf32, #tpu.memory_space<vmem>>) attributes {dimension_semantics = [#tpu.dimension_semantics<parallel>, #tpu.dimension_semantics<arbitrary>], iteration_bounds = array<i64: 1, 1>, scalar_prefetch = 0 : i64, scratch_operands = 0 : i64, tpu.core_type = #tpu.core_type<tc>, window_params = [{transform_indices = @transform_0, window_bounds = array<i64: 10, 128>}, {transform_indices = @transform_1, window_bounds = array<i64: 1, 128>}, {transform_indices = @transform_2, window_bounds = array<i64: 3, 128>}]} {
    %c0_i32 = arith.constant 0 : i32
    %0 = arith.cmpi eq, %arg1, %c0_i32 : i32
    %1 = arith.extui %0 : i1 to i32
    %c0_i32_0 = arith.constant 0 : i32
    %2 = arith.cmpi ne, %1, %c0_i32_0 : i32
    scf.if %2 {
      %cst_16 = arith.constant 0.000000e+00 : f32
      %64 = vector.broadcast %cst_16 : f32 to vector<3x128xf32>
      %c0_17 = arith.constant 0 : index
      %c0_18 = arith.constant 0 : index
      %65 = vector.load %arg4[%c0_17, %c0_18] : memref<3x128xf32, #tpu.memory_space<vmem>>, vector<3x128xf32>
      tpu.vector_store %arg4[%c0_17, %c0_18], %64 {strides = array<i32>} : memref<3x128xf32, #tpu.memory_space<vmem>>, vector<3x128xf32>,
    } else {
    }
    %c0 = arith.constant 0 : index
    %c0_1 = arith.constant 0 : index
    %3 = vector.load %arg2[%c0, %c0_1] : memref<10x128xf32, #tpu.memory_space<vmem>>, vector<10x128xf32>
    %c0_2 = arith.constant 0 : index
    %c0_3 = arith.constant 0 : index
    %4 = vector.load %arg3[%c0_2, %c0_3] : memref<1x128xi32, #tpu.memory_space<vmem>>, vector<1x128xi32>
    %c1_i32 = arith.constant 1 : i32
    %5 = arith.muli %arg0, %c1_i32 : i32
    %6 = arith.addi %5, %arg1 : i32
    %c128_i32 = arith.constant 128 : i32
    %7 = arith.muli %6, %c128_i32 : i32
    %8 = tpu.iota {dimensions = array<i32: 1>} : vector<1x128xi32>
    %9 = vector.broadcast %7 : i32 to vector<1x128xi32>
    %10 = arith.addi %9, %8 : vector<1x128xi32>
    %c64_i32 = arith.constant 64 : i32
    %11 = vector.broadcast %c64_i32 : i32 to vector<1x128xi32>
    %12 = arith.cmpi slt, %10, %11 : vector<1x128xi32>
    %c255_i32 = arith.constant 255 : i32
    %13 = vector.broadcast %c255_i32 : i32 to vector<1x128xi32>
    %14 = arith.cmpi ne, %4, %13 : vector<1x128xi32>
    %15 = arith.andi %14, %12 : vector<1x128xi1>
    %16 = tpu.iota {dimensions = array<i32: 0>} : vector<10x128xi32>
    %17 = vector.broadcast %4 : vector<1x128xi32> to vector<10x128xi32>
    %18 = arith.cmpi eq, %16, %17 : vector<10x128xi32>
    %19 = arith.extui %18 : vector<10x128xi1> to vector<10x128xi32>
    %20 = arith.sitofp %19 : vector<10x128xi32> to vector<10x128xf32>
    %cst = arith.constant dense<0xFF800000> : vector<128xf32>
    %21 = vector.multi_reduction <maximumf>, %3, %cst [0] : vector<10x128xf32> to vector<128xf32>
    %22 = vector.shape_cast %21 : vector<128xf32> to vector<1x128xf32>
    %23 = vector.broadcast %22 : vector<1x128xf32> to vector<10x128xf32>
    %24 = arith.subf %3, %23 : vector<10x128xf32>
    %25 = math.exp %24 : vector<10x128xf32>
    %cst_4 = arith.constant dense<0.000000e+00> : vector<128xf32>
    %26 = vector.multi_reduction <add>, %25, %cst_4 [0] : vector<10x128xf32> to vector<128xf32>
    %27 = vector.shape_cast %26 : vector<128xf32> to vector<1x128xf32>
    %28 = arith.mulf %20, %3 : vector<10x128xf32>
    %cst_5 = arith.constant dense<0.000000e+00> : vector<128xf32>
    %29 = vector.multi_reduction <add>, %28, %cst_5 [0] : vector<10x128xf32> to vector<128xf32>
    %30 = vector.shape_cast %29 : vector<128xf32> to vector<1x128xf32>
    %31 = math.log %27 : vector<1x128xf32>
    %32 = arith.addf %22, %31 : vector<1x128xf32>
    %33 = arith.subf %32, %30 : vector<1x128xf32>
    %34 = arith.subf %30, %22 : vector<1x128xf32>
    %35 = math.exp %34 : vector<1x128xf32>
    %cst_6 = arith.constant 0.000000e+00 : f32
    %36 = vector.broadcast %cst_6 : f32 to vector<1x128xf32>
    %37 = arith.select %15, %35, %36 : vector<1x128xi1>, vector<1x128xf32>
    %38 = arith.subf %27, %37 : vector<1x128xf32>
    %cst_7 = arith.constant 9.21034049 : f32
    %39 = vector.broadcast %cst_7 : f32 to vector<1x128xf32>
    %40 = arith.mulf %39, %38 : vector<1x128xf32>
    %41 = arith.divf %40, %27 : vector<1x128xf32>
    %cst_8 = arith.constant 0.000000e+00 : f32
    %42 = vector.broadcast %cst_8 : f32 to vector<1x128xf32>
    %43 = arith.select %15, %33, %42 : vector<1x128xi1>, vector<1x128xf32>
    %44 = arith.extui %15 : vector<1x128xi1> to vector<1x128xi32>
    %45 = arith.sitofp %44 : vector<1x128xi32> to vector<1x128xf32>
    %cst_9 = arith.constant 0.000000e+00 : f32
    %46 = vector.broadcast %cst_9 : f32 to vector<1x128xf32>
    %47 = arith.select %12, %41, %46 : vector<1x128xi1>, vector<1x128xf32>
    %48 = tpu.iota {dimensions = array<i32: 0>} : vector<3x128xi32>
    %c0_10 = arith.constant 0 : index
    %c0_11 = arith.constant 0 : index
    %49 = vector.load %arg4[%c0_10, %c0_11] : memref<3x128xf32, #tpu.memory_space<vmem>>, vector<3x128xf32>
    %c0_i32_12 = arith.constant 0 : i32
    %50 = vector.broadcast %c0_i32_12 : i32 to vector<3x128xi32>
    %51 = arith.cmpi eq, %48, %50 : vector<3x128xi32>
    %c1_i32_13 = arith.constant 1 : i32
    %52 = vector.broadcast %c1_i32_13 : i32 to vector<3x128xi32>
    %53 = arith.cmpi eq, %48, %52 : vector<3x128xi32>
    %54 = vector.shape_cast %45 : vector<1x128xf32> to vector<1x128xf32>
    %55 = vector.broadcast %54 : vector<1x128xf32> to vector<3x128xf32>
    %56 = vector.shape_cast %47 : vector<1x128xf32> to vector<1x128xf32>
    %57 = vector.broadcast %56 : vector<1x128xf32> to vector<3x128xf32>
    %58 = arith.select %53, %55, %57 : vector<3x128xi1>, vector<3x128xf32>
    %59 = vector.shape_cast %43 : vector<1x128xf32> to vector<1x128xf32>
    %60 = vector.broadcast %59 : vector<1x128xf32> to vector<3x128xf32>
    %61 = arith.select %51, %60, %58 : vector<3x128xi1>, vector<3x128xf32>
    %62 = arith.addf %49, %61 : vector<3x128xf32>
    %c0_14 = arith.constant 0 : index
    %c0_15 = arith.constant 0 : index
    %63 = vector.load %arg4[%c0_14, %c0_15] : memref<3x128xf32, #tpu.memory_space<vmem>>, vector<3x128xf32>
    tpu.vector_store %arg4[%c0_14, %c0_15], %62 {strides = array<i32>} : memref<3x128xf32, #tpu.memory_space<vmem>>, vector<3x128xf32>,
    return
  }
  func.func @transform_0(%arg0: i32, %arg1: i32) -> (i32, i32) {
    %c1_i32 = arith.constant 1 : i32
    %0 = arith.muli %arg0, %c1_i32 : i32
    %1 = arith.addi %0, %arg1 : i32
    %c0_i32 = arith.constant 0 : i32
    %c0_i32_0 = arith.constant 0 : i32
    return %c0_i32, %1 : i32, i32
  }
  func.func @transform_1(%arg0: i32, %arg1: i32) -> (i32, i32) {
    %c1_i32 = arith.constant 1 : i32
    %0 = arith.muli %arg0, %c1_i32 : i32
    %1 = arith.addi %0, %arg1 : i32
    %c0_i32 = arith.constant 0 : i32
    %c0_i32_0 = arith.constant 0 : i32
    return %c0_i32, %1 : i32, i32
  }
  func.func @transform_2(%arg0: i32, %arg1: i32) -> (i32, i32) {
    %c0_i32 = arith.constant 0 : i32
    %c0_i32_0 = arith.constant 0 : i32
    return %c0_i32, %arg0 : i32, i32
  }
}

</mosaic_0001>

<bundles_post_ra>
// kernel: tpu_custom_call.1
= control target key start
LH: loop header
LB: loop body
LE: loop exit
PB: predicated region body
PF: predicated region fallthrough
CT: control target
= control target key end

     0   :  { %7 = vsyncpa [#allocation3], 0  ;;  %s309_s0 = inlined_call_operand.hbm [shape: f32[10,64], index: 0, kind: input, shape index: {}]   ;;  %s310_s1 = inlined_call_operand.vmem [shape: s32[1,64], index: 1, kind: input, shape index: {}]   ;;  %s311_s2 = inlined_call_operand.hbm [shape: f32[3,128], index: 2, kind: output, shape index: {}]  }
   0x1   :  { %8 = vsyncpa [#allocation4], 0  ;;  %s230_s9 = smov [#allocation2]   ;;  %s182_s13 = scalar_lea.hbm %s309_s0, 256 }
   0x2   :  { %s17_s10 = sshll.u32 %s230_s9, 4  ;;  %p183_p0 = scmp.ne.s32.totalorder %s309_s0, %s182_s13  ;;  %s18_s10 = int_to_ptr.vmem [resolvable:$true] %s17_s10 }
   0x3   :  { %p186_p1 = scmp.lt.u32.totalorder %s182_s13, %s309_s0 }
   0x5   :  { %p188_p2 = pnand %p186_p1, %p183_p0 }
   0x7   :  { %191 = shalt.err (!%p188_p2)
}
   0x8   :  { %s192_s18 = scalar_lea.vmem %s18_s10, 256  ;;  %p197_p4 = scmp.lt.s32.totalorder %s18_s10, %s18_s10 }
   0x9   :  { %p193_p3 = scmp.ne.s32.totalorder %s18_s10, %s192_s18  ;;  %p198_p5 = scmp.lt.s32.totalorder %s192_s18, %s192_s18 }
   0xb   :  { %p199_p6 = por %p198_p5, %p197_p4 }
   0xd   :  { %p200_p7 = pnand %p199_p6, %p193_p3 }
   0xf   :  { %203 = shalt.err (!%p200_p7)
}
  0x10   :  { %s231_s19 = smov 128   ;;  %s232_s20 = smov 8  }
  0x11   :  { %23 = dma.hbm_to_vmem [thread:$0]  %s309_s0, 256, %s18_s10, [#allocation3], %s231_s19, %s231_s19, %s232_s20  }
  0x12   :  { %226 = dma.done.wait [#allocation3], 256  }
  0x13   :  { %227 = vsyncadd [#allocation3], 4294967040  ;;  %v54_v0 = vlaneseq  ;;  %v233_v1 = vmov 0.0   ;;  %vm74_vm0 = vcmask 1041408   ;;  %v49_v5 = vld [vmem:[#allocation2] sm:$0xff]  ;;  %s234_s0 = smov [#allocation5]  }
  0x14   :  { %48 = vst [vmem:[#allocation5] sm:$0x7] %v233_v1  ;;  %v50_v6 = vld [vmem:[#allocation2 + $0x8] sm:$0x3]  ;;  %v51_v7 = vld [vmem:[%s310_s1] sm:$0x1] }
  0x15   :  { %v263_v2 = vshrl.u32 %v54_v0, 7  ;;  %v75_v9 = vsel %vm74_vm0, %v50_v6, -inf  ;;  %v55_v40 = vand.u32 127, %v54_v0  ;;  %vm59_vm4 = vcmp.ne.s32.totalorder %v51_v7, 255  ;;  %s152_s1 = sshll.u32 %s234_s0, 4  ;;  %s153_s1 = int_to_ptr.vmem [resolvable:$true] %s152_s1 }
  0x16   :  { %v76_v10 = vmax.f32 %v49_v5, %v75_v9  ;;  %s204_s25 = scalar_lea.vmem %s153_s1, 64  ;;  %p209_p9 = scmp.lt.s32.totalorder %s153_s1, %s153_s1 }
  0x17   :  { %v266_v3 = vsub.s32 0, %v263_v2  ;;  %v63_v4 = vadd.s32 8, %v263_v2  ;;  %vm58_vm3 = vcmp.lt.s32.totalorder %v55_v40, 64  ;;  %vm125_vm6 = vcmp.eq.s32.totalorder %v263_v2, 1  ;;  %p205_p8 = scmp.ne.s32.totalorder %s153_s1, %s204_s25  ;;  %p210_p10 = scmp.lt.s32.totalorder %s204_s25, %s204_s25 }
  0x18   :  { %v77_v13 = vrot.slane %v76_v10, 4  ;;  %vm280_vm5 = vmand %vm59_vm4, %vm58_vm3  ;;  %vm124_vm7 = vcmp.eq.s32.totalorder %v263_v2, 0 }
  0x19   :  { %v67_v8 = vrot.slane %v51_v7, %v266_v3  ;;  %v166_v54 = vsel %vm280_vm5, 1.0, %v233_v1  ;;  %p211_p11 = por %p210_p10, %p209_p9 }
  0x1a   :  { %v78_v16 = vmax.f32 %v76_v10, %v77_v13  ;;  %v130_v57 = vrot.slane %v166_v54, %v266_v3 }
  0x1b   :  { %vm68_vm1 = vcmp.eq.s32.totalorder %v263_v2, %v67_v8  ;;  %vm69_vm2 = vcmp.eq.s32.totalorder %v63_v4, %v67_v8  ;;  %v123_v63 = vld [vmem:[#allocation5] sm:$0x7]  ;;  %p212_p12 = pnand %p211_p11, %p205_p8 }
  0x1c   :  { %v164_v11 = vsel %vm68_vm1, 1.0, %v233_v1  ;;  %v165_v12 = vsel %vm69_vm2, 1.0, %v233_v1  ;;  %v79_v18 = vrot.slane %v78_v16, 2 }
  0x1d   :  { %v97_v14 = vmul.f32 %v164_v11, %v49_v5  ;;  %v98_v15 = vmul.f32 %v165_v12, %v50_v6 }
  0x1e   :  { %v80_v20 = vmax.f32 %v78_v16, %v79_v18 }
  0x1f   :  { %v99_v17 = vsel %vm74_vm0, %v98_v15, 0.0 }
  0x20   :  { %v100_v19 = vadd.f32 %v99_v17, %v97_v14  ;;  %v81_v22 = vrot.slane %v80_v20, 1 }
  0x22   :  { %v101_v21 = vrot.slane %v100_v19, 4  ;;  %v82_v24 = vmax.f32 %v80_v20, %v81_v22 }
  0x24   :  { %v102_v23 = vadd.f32 %v101_v21, %v100_v19  ;;  %v83_v26 = vsub.f32 %v49_v5, %v82_v24  ;;  %v84_v27 = vsub.f32 %v50_v6, %v82_v24 }
  0x26   :  { %v103_v25 = vrot.slane %v102_v23, 2  ;;  %v85_v29 = vmul.f32 1.442695, %v83_v26  ;;  %v87_v30 = vmul.f32 1.442695, %v84_v27 }
  0x28   :  { %v104_v28 = vadd.f32 %v103_v25, %v102_v23  ;;  %172 = vpow2.f32 %v85_v29 }
  0x29   :  { %174 = vpow2.f32 %v87_v30 }
  0x2a   :  { %v105_v31 = vrot.slane %v104_v28, 1 }
  0x2c   :  { %v106_v32 = vadd.f32 %v105_v31, %v104_v28 }
  0x2e   :  { %v111_v33 = vsub.f32 %v106_v32, %v82_v24 }
  0x30   :  { %v112_v35 = vmul.f32 1.442695, %v111_v33 }
  0x32   :  { %v173_v34 = vpop.eup %172  ;;  %176 = vpow2.f32 %v112_v35 }
  0x33   :  { %v175_v36 = vpop.eup %174 }
  0x34   :  { %v89_v37 = vsel %vm74_vm0, %v175_v36, 0.0 }
  0x35   :  { %v90_v38 = vadd.f32 %v173_v34, %v89_v37 }
  0x37   :  { %v91_v39 = vrot.slane %v90_v38, 4 }
  0x39   :  { %v92_v41 = vadd.f32 %v91_v39, %v90_v38 }
  0x3b   :  { %v93_v42 = vrot.slane %v92_v41, 2 }
  0x3c   :  { %v177_v45 = vpop.eup %176 }
  0x3d   :  { %v94_v43 = vadd.f32 %v93_v42, %v92_v41  ;;  %v114_v48 = vsel %vm280_vm5, %v177_v45, 0.0 }
  0x3f   :  { %v95_v44 = vrot.slane %v94_v43, 1 }
  0x41   :  { %v96_v47 = vadd.f32 %v95_v44, %v94_v43 }
  0x43   :  { %178 = vrcp.f32 %v96_v47  ;;  %v115_v49 = vsub.f32 %v96_v47, %v114_v48 }
  0x44   :  { %180 = vlog2.f32 %v96_v47 }
  0x45   :  { %v116_v50 = vmul.f32 9.2103405, %v115_v49 }
  0x4d   :  { %v179_v51 = vpop.eup %178 }
  0x4e   :  { %v181_v52 = vpop.eup %180  ;;  %v118_v53 = vmul.f32 %v179_v51, %v116_v50 }
  0x4f   :  { %v108_v55 = vmul.f32 0.6931472, %v181_v52 }
  0x50   :  { %v122_v56 = vsel %vm58_vm3, %v118_v53, 0.0 }
  0x51   :  { %v109_v58 = vadd.f32 %v108_v55, %v82_v24  ;;  %v135_v59 = vrot.slane %v122_v56, %v266_v3 }
  0x53   :  { %v110_v60 = vsub.f32 %v109_v58, %v106_v32  ;;  %v136_v62 = vsel %vm125_vm6, %v130_v57, %v135_v59 }
  0x55   :  { %v119_v61 = vsel %vm280_vm5, %v110_v60, 0.0 }
  0x56   :  { %v141_v0 = vrot.slane %v119_v61, %v266_v3 }
  0x58   :  { %v143_v1 = vsel %vm124_vm7, %v141_v0, %v136_v62 }
  0x59   :  { %v144_v4 = vadd.f32 %v143_v1, %v123_v63 }
  0x5b   :  { %145 = vst [vmem:[#allocation5] sm:$0x7] %v144_v4 }
  0x5c   :  { %215 = shalt.err (!%p212_p12)
}
  0x5d   :  { %s216_s28 = scalar_lea.hbm %s311_s2, 64 }
  0x5e   :  { %p217_p13 = scmp.ne.s32.totalorder %s311_s2, %s216_s28  ;;  %p220_p0 = scmp.lt.u32.totalorder %s216_s28, %s311_s2 }
  0x60   :  { %p222_p1 = pnand %p220_p0, %p217_p13 }
  0x62   :  { %225 = shalt.err (!%p222_p1)
}
  0x63   :  { %155 = dma.vmem_to_hbm [thread:$0]  %s153_s1, 64, %s311_s2, [#allocation4]  }
  0x64   :  { %228 = dma.done.wait [#allocation4], 64  }
  0x65   :  { %229 = vsyncadd [#allocation4], 4294967232 }
  0x66   :  { %159 = vsyncpa [#allocation3], 1 }
  0x67   :  { %160 = vsyncpa [#allocation4], 1 }

</bundles_post_ra>
